<compile_context>
chip_gen: v7x
topology: tpu7x:2x2x1
jax: 0.10.0
libtpu: 0.0.40
codegen_flags: <defaults>
</compile_context>

<pallas_src>
import functools

import jax
import jax.numpy as jnp
from jax.experimental import pallas as pl
from jax.experimental.pallas import tpu as pltpu


def fused_conv_bn_lrelu_kernel(p_ref, w_ref, g_ref, bt_ref, o_ref,
                               y_scr, sum_scr, ssq_scr,
                               *, count, eps, neg_slope):
    """grid = (phase, sample).  phase 0: conv + BN stats.  phase 1: BN affine + LeakyReLU."""
    phase = pl.program_id(0)
    t = pl.program_id(1)
    R = y_scr.shape[1]          # = H * W valid output pixels per sample

    @pl.when(jnp.logical_and(phase == 0, t == 0))
    def _init():
        sum_scr[...] = jnp.zeros_like(sum_scr)
        ssq_scr[...] = jnp.zeros_like(ssq_scr)
        # Phase 0 parks its output block on block 0 and never writes it; zero-fill once so an
        # early writeback could only ever flush zeros, never uninitialized VMEM.
        o_ref[...] = jnp.zeros_like(o_ref)

    @pl.when(phase == 0)
    def _conv_and_stats():
        # ONE K=27 MXU matmul per sample (tap-packed im2col built by the wrapper).
        acc = jnp.dot(p_ref[...], w_ref[...], preferred_element_type=jnp.float32)
        y_scr[t] = acc          # conv output stays VMEM-resident (no HBM round trip)
        # BN partial sums on the MXU (its slot is under-utilized here) instead of VPU/XLU
        # reductions.  `ones` has 8 identical rows to keep sublane-aligned shapes; row 0 of
        # each result is the per-channel column sum.
        ones = jnp.ones((8, R), jnp.float32)
        sum_scr[...] += jnp.dot(ones, acc, preferred_element_type=jnp.float32)[0:1, :]
        ssq_scr[...] += jnp.dot(ones, acc * acc, preferred_element_type=jnp.float32)[0:1, :]

    @pl.when(jnp.logical_and(phase == 1, t == 0))
    def _fold_stats():
        # Fold batch statistics into a single per-channel scale/shift, once.
        inv_n = 1.0 / count
        mean = sum_scr[...] * inv_n
        var = jnp.maximum(ssq_scr[...] * inv_n - mean * mean, 0.0)
        scale = g_ref[...] * jax.lax.rsqrt(var + eps)
        shift = bt_ref[...] - mean * scale
        sum_scr[...] = scale
        ssq_scr[...] = shift

    @pl.when(phase == 1)
    def _bn_lrelu():
        yn = y_scr[t] * sum_scr[...] + ssq_scr[...]
        o_ref[...] = jnp.where(yn >= 0.0, yn, neg_slope * yn)   # LeakyReLU(0.01)


def _vmem_limit_bytes():
    cap = 64 * 1024 * 1024                      # conservative default: v7x has 64 MiB / TC
    try:
        cap = int(pltpu.get_tpu_info().vmem_capacity_bytes)   # generation-aware when available
    except Exception:
        pass
    return max(32 * 1024 * 1024, min(int(cap * 0.6), 100 * 1024 * 1024))


@functools.partial(jax.jit, static_argnames=("eps", "negative_slope"))
def conv_batch_lrelu(x_nchw, w, b, gamma, beta, *, eps=1e-5, negative_slope=0.01):
    N, Cin, H, W = x_nchw.shape
    Cout, Cin_w, KH, KW = w.shape
    assert Cin_w == Cin and KH == 3 and KW == 3, "kernel written for 3x3 / stride 1 / pad 1"
    R = H * W                                   # valid output pixels per sample (no junk rows)
    P = KH * KW * Cin                           # tap-packed patch width (27 for Cin=3)
    lane = 128

    # ---- thin XLA glue: NCHW -> NHWC, zero-pad, tap-packed im2col [N, R, 27] ----
    x = jnp.transpose(x_nchw, (0, 2, 3, 1)).astype(jnp.float32)
    xp = jnp.pad(x, ((0, 0), (1, 1), (1, 1), (0, 0)))
    taps = [xp[:, dy:dy + H, dx:dx + W, :] for dy in range(KH) for dx in range(KW)]
    patches = jnp.concatenate(taps, axis=-1).reshape(N, R, P)

    # weights OIHW -> single [27, Cout] matrix (same (dy, dx, cin) packing as the patches)
    w27 = jnp.transpose(w, (2, 3, 1, 0)).reshape(P, Cout).astype(jnp.float32)
    g_row = gamma.reshape(1, Cout).astype(jnp.float32)
    bt_row = beta.reshape(1, Cout).astype(jnp.float32)
    # Conv bias intentionally unused: training-mode BatchNorm subtracts the batch mean, which
    # cancels a per-channel bias exactly. (Would be WRONG for eval-mode/running-stats BN.)
    del b

    count = float(N * R)

    # ---- generation-aware VMEM budget (v7x: 64 MiB/TC, v5e/v6e: 128 MiB) ----
    vmem_limit = _vmem_limit_bytes()
    vmem_est = 4 * (N * R * Cout                 # resident conv-output scratch
                    + 2 * R * lane               # patch block (27 lanes pad to 128), 2-buffered
                    + 2 * R * Cout               # output block, 2-buffered
                    + 2 * 32 * Cout              # w27 (27 sublanes pad to 32), 2-buffered
                    + 6 * 8 * lane)              # gamma/beta blocks + sum/ssq scratch
    # TODO(synk): row-group tiling fallback (tile R with per-group partial stats) + v7x
    # dual-TensorCore split of the sample axis with per-core partial sums, for batches whose
    # whole conv output does not fit the per-generation VMEM budget.
    assert vmem_est < vmem_limit, ("shape too large for VMEM-resident fusion",
                                   vmem_est, vmem_limit)

    kernel = functools.partial(
        fused_conv_bn_lrelu_kernel,
        count=count, eps=float(eps), neg_slope=float(negative_slope))

    out = pl.pallas_call(
        kernel,
        out_shape=jax.ShapeDtypeStruct((N, R, Cout), jnp.float32),
        grid_spec=pltpu.PrefetchScalarGridSpec(
            num_scalar_prefetch=0,
            grid=(2, N),                                   # (phase, sample)
            in_specs=[
                # patches: sample t in phase 0; park on the LAST block during phase 1 so the
                # phase transition does not trigger a redundant re-fetch of sample 0.
                pl.BlockSpec((None, R, P), lambda p, t: ((1 - p) * t + p * (N - 1), 0, 0)),
                # constant-index blocks: fetched once (index never changes).  Double-buffering
                # them wastes only ~40 KiB, so pl.Buffered(1) is skipped for lowering safety.
                pl.BlockSpec((P, Cout), lambda p, t: (0, 0)),
                pl.BlockSpec((1, Cout), lambda p, t: (0, 0)),
                pl.BlockSpec((1, Cout), lambda p, t: (0, 0)),
            ],
            # phase 0 never produces output; its block is parked on (zero-filled) block 0,
            # which phase 1 fully overwrites before the first HBM flush.
            out_specs=pl.BlockSpec((None, R, Cout), lambda p, t: (p * t, 0, 0)),
            scratch_shapes=[pltpu.VMEM((N, R, Cout), jnp.float32),   # resident conv output
                            pltpu.VMEM((1, Cout), jnp.float32),      # sum   -> scale
                            pltpu.VMEM((1, Cout), jnp.float32)],     # sumsq -> shift
        ),
        compiler_params=pltpu.CompilerParams(
            # Both grid axes carry state (stats accumulation / VMEM-resident y) -> "arbitrary".
            dimension_semantics=("arbitrary", "arbitrary"),
            vmem_limit_bytes=vmem_limit),
    )(patches, w27, g_row, bt_row)

    # [N, H*W, Cout] -> NCHW (reshape/transpose fuse inside this jit).
    out = out.reshape(N, H, W, Cout)
    out = jnp.transpose(out, (0, 3, 1, 2))
    # TODO(synk): nn.Dropout2d(0.25) is stochastic train-time channel dropout; identity for a
    # deterministic forward pass, so it is not applied here.
    # TODO(synk): for large feature maps, feed bf16 patches/weights to the MXU (keep f32
    # accumulation + f32 BN math) to double v6e/v7x matmul throughput.
    return out


def _reference(x_nchw, w, b, gamma, beta, eps=1e-5, negative_slope=0.01):
    """Pure-JAX reference: Conv2d(3x3,p=1)+bias -> BatchNorm2d(train) -> LeakyReLU(0.01)."""
    x = x_nchw.astype(jnp.float32)
    y = jax.lax.conv_general_dilated(
        x, w.astype(jnp.float32), window_strides=(1, 1), padding=((1, 1), (1, 1)),
        dimension_numbers=("NCHW", "OIHW", "NCHW"))
    y = y + b.reshape(1, -1, 1, 1)
    mean = jnp.mean(y, axis=(0, 2, 3), keepdims=True)
    var = jnp.mean((y - mean) ** 2, axis=(0, 2, 3), keepdims=True)   # biased (training BN)
    yn = (y - mean) * jax.lax.rsqrt(var + eps)
    yn = yn * gamma.reshape(1, -1, 1, 1) + beta.reshape(1, -1, 1, 1)
    out = jnp.where(yn >= 0.0, yn, negative_slope * yn)              # LeakyReLU(0.01)
    return out                                                       # Dropout2d -> identity


if __name__ == "__main__":
    N, Cin, H, W = 2, 3, 16, 16
    Cout, KH, KW = 128, 3, 3

    key = jax.random.PRNGKey(0)
    kx, kw, kb = jax.random.split(key, 3)

    x = jax.random.normal(kx, (N, Cin, H, W), dtype=jnp.float32)
    # deterministic synthetic parameters (nn.BatchNorm2d defaults: weight=1, bias=0)
    conv_w = jax.random.normal(kw, (Cout, Cin, KH, KW), dtype=jnp.float32) * 0.1
    conv_b = jax.random.normal(kb, (Cout,), dtype=jnp.float32) * 0.1
    bn_gamma = jnp.ones((Cout,), dtype=jnp.float32)
    bn_beta = jnp.zeros((Cout,), dtype=jnp.float32)

    out = conv_batch_lrelu(x, conv_w, conv_b, bn_gamma, bn_beta)
    out = jax.block_until_ready(out)

    ref = _reference(x, conv_w, conv_b, bn_gamma, bn_beta)
    assert out.shape == (N, Cout, H, W), out.shape
    err = float(jnp.max(jnp.abs(out - ref)))
    assert jnp.allclose(out, ref, atol=1e-3, rtol=1e-3), err

    print("KERNEL_OK")
</pallas_src>

<mosaic_0001>
module attributes {stable_mosaic.version = 11 : i64} {
  func.func @fused_conv_bn_lrelu_kernel(%arg0: i32, %arg1: i32, %arg2: memref<1x256x27xf32, #tpu.memory_space<vmem>>, %arg3: memref<27x128xf32, #tpu.memory_space<vmem>>, %arg4: memref<1x128xf32, #tpu.memory_space<vmem>>, %arg5: memref<1x128xf32, #tpu.memory_space<vmem>>, %arg6: memref<1x256x128xf32, #tpu.memory_space<vmem>>, %arg7: memref<2x256x128xf32, #tpu.memory_space<vmem>>, %arg8: memref<1x128xf32, #tpu.memory_space<vmem>>, %arg9: memref<1x128xf32, #tpu.memory_space<vmem>>) attributes {dimension_semantics = [#tpu.dimension_semantics<arbitrary>, #tpu.dimension_semantics<arbitrary>], iteration_bounds = array<i64: 2, 2>, scalar_prefetch = 0 : i64, scratch_operands = 3 : i64, tpu.core_type = #tpu.core_type<tc>, window_params = [{transform_indices = @transform_0, window_bounds = array<i64: 1, 256, 27>}, {pipeline_mode = #tpu.pipeline_mode<synchronous>, transform_indices = @transform_1, window_bounds = array<i64: 27, 128>}, {pipeline_mode = #tpu.pipeline_mode<synchronous>, transform_indices = @transform_2, window_bounds = array<i64: 1, 128>}, {pipeline_mode = #tpu.pipeline_mode<synchronous>, transform_indices = @transform_3, window_bounds = array<i64: 1, 128>}, {transform_indices = @transform_4, window_bounds = array<i64: 1, 256, 128>}]} {
    %c0_i32 = arith.constant 0 : i32
    %0 = arith.cmpi eq, %arg0, %c0_i32 : i32
    %c0_i32_0 = arith.constant 0 : i32
    %1 = arith.cmpi eq, %arg1, %c0_i32_0 : i32
    %2 = arith.andi %0, %1 : i1
    %3 = arith.extui %2 : i1 to i32
    %c0_i32_1 = arith.constant 0 : i32
    %4 = arith.cmpi ne, %3, %c0_i32_1 : i32
    scf.if %4 {
      %cst = arith.constant 0.000000e+00 : f32
      %16 = vector.broadcast %cst : f32 to vector<1x128xf32>
      %c0 = arith.constant 0 : index
      %c0_8 = arith.constant 0 : index
      %17 = vector.load %arg8[%c0, %c0_8] : memref<1x128xf32, #tpu.memory_space<vmem>>, vector<1x128xf32>
      tpu.vector_store %arg8[%c0, %c0_8], %16 {strides = array<i32>} : memref<1x128xf32, #tpu.memory_space<vmem>>, vector<1x128xf32>,
      %cst_9 = arith.constant 0.000000e+00 : f32
      %18 = vector.broadcast %cst_9 : f32 to vector<1x128xf32>
      %c0_10 = arith.constant 0 : index
      %c0_11 = arith.constant 0 : index
      %19 = vector.load %arg9[%c0_10, %c0_11] : memref<1x128xf32, #tpu.memory_space<vmem>>, vector<1x128xf32>
      tpu.vector_store %arg9[%c0_10, %c0_11], %18 {strides = array<i32>} : memref<1x128xf32, #tpu.memory_space<vmem>>, vector<1x128xf32>,
      %cst_12 = arith.constant 0.000000e+00 : f32
      %20 = vector.broadcast %cst_12 : f32 to vector<256x128xf32>
      %c0_13 = arith.constant 0 : index
      %c0_14 = arith.constant 0 : index
      %c0_15 = arith.constant 0 : index
      %21 = vector.load %arg6[%c0_13, %c0_14, %c0_15] : memref<1x256x128xf32, #tpu.memory_space<vmem>>, vector<1x256x128xf32>
      %22 = vector.shape_cast %21 : vector<1x256x128xf32> to vector<256x128xf32>
      %23 = vector.shape_cast %20 : vector<256x128xf32> to vector<1x256x128xf32>
      tpu.vector_store %arg6[%c0_13, %c0_14, %c0_15], %23 {strides = array<i32>} : memref<1x256x128xf32, #tpu.memory_space<vmem>>, vector<1x256x128xf32>,
    } else {
    }
    %c0_i32_2 = arith.constant 0 : i32
    %5 = arith.cmpi eq, %arg0, %c0_i32_2 : i32
    %6 = arith.extui %5 : i1 to i32
    %c0_i32_3 = arith.constant 0 : i32
    %7 = arith.cmpi ne, %6, %c0_i32_3 : i32
    scf.if %7 {
      %c0 = arith.constant 0 : index
      %c0_8 = arith.constant 0 : index
      %c0_9 = arith.constant 0 : index
      %16 = vector.load %arg2[%c0, %c0_8, %c0_9] : memref<1x256x27xf32, #tpu.memory_space<vmem>>, vector<1x256x27xf32>
      %17 = vector.shape_cast %16 : vector<1x256x27xf32> to vector<256x27xf32>
      %c0_10 = arith.constant 0 : index
      %c0_11 = arith.constant 0 : index
      %18 = vector.load %arg3[%c0_10, %c0_11] : memref<27x128xf32, #tpu.memory_space<vmem>>, vector<27x128xf32>
      %cst = arith.constant dense<0.000000e+00> : vector<256x128xf32>
      %19 = tpu.matmul %17, %18, %cst {dimension_numbers = #tpu.dot_dimension_numbers<[1], [0], [0], [1], [0, 0, 1, 1], [], []>} : vector<256x27xf32>, vector<27x128xf32>, vector<256x128xf32> -> vector<256x128xf32>
      %20 = arith.index_cast %arg1 : i32 to index
      %c0_12 = arith.constant 0 : index
      %c0_13 = arith.constant 0 : index
      %21 = vector.load %arg7[%20, %c0_12, %c0_13] : memref<2x256x128xf32, #tpu.memory_space<vmem>>, vector<1x256x128xf32>
      %22 = vector.shape_cast %21 : vector<1x256x128xf32> to vector<256x128xf32>
      %23 = vector.shape_cast %19 : vector<256x128xf32> to vector<1x256x128xf32>
      tpu.vector_store %arg7[%20, %c0_12, %c0_13], %23 {strides = array<i32>} : memref<2x256x128xf32, #tpu.memory_space<vmem>>, vector<1x256x128xf32>,
      %cst_14 = arith.constant 1.000000e+00 : f32
      %24 = vector.broadcast %cst_14 : f32 to vector<8x256xf32>
      %c0_15 = arith.constant 0 : index
      %c0_16 = arith.constant 0 : index
      %25 = vector.load %arg8[%c0_15, %c0_16] : memref<1x128xf32, #tpu.memory_space<vmem>>, vector<1x128xf32>
      %cst_17 = arith.constant dense<0.000000e+00> : vector<8x128xf32>
      %26 = tpu.matmul %24, %19, %cst_17 {dimension_numbers = #tpu.dot_dimension_numbers<[1], [0], [0], [1], [0, 0, 1, 1], [], []>} : vector<8x256xf32>, vector<256x128xf32>, vector<8x128xf32> -> vector<8x128xf32>
      %27 = vector.extract_strided_slice %26 {offsets = [0, 0], sizes = [1, 128], strides = [1, 1]} : vector<8x128xf32> to vector<1x128xf32>
      %28 = arith.addf %25, %27 : vector<1x128xf32>
      %c0_18 = arith.constant 0 : index
      %c0_19 = arith.constant 0 : index
      %29 = vector.load %arg8[%c0_18, %c0_19] : memref<1x128xf32, #tpu.memory_space<vmem>>, vector<1x128xf32>
      tpu.vector_store %arg8[%c0_18, %c0_19], %28 {strides = array<i32>} : memref<1x128xf32, #tpu.memory_space<vmem>>, vector<1x128xf32>,
      %c0_20 = arith.constant 0 : index
      %c0_21 = arith.constant 0 : index
      %30 = vector.load %arg9[%c0_20, %c0_21] : memref<1x128xf32, #tpu.memory_space<vmem>>, vector<1x128xf32>
      %31 = arith.mulf %19, %19 : vector<256x128xf32>
      %cst_22 = arith.constant dense<0.000000e+00> : vector<8x128xf32>
      %32 = tpu.matmul %24, %31, %cst_22 {dimension_numbers = #tpu.dot_dimension_numbers<[1], [0], [0], [1], [0, 0, 1, 1], [], []>} : vector<8x256xf32>, vector<256x128xf32>, vector<8x128xf32> -> vector<8x128xf32>
      %33 = vector.extract_strided_slice %32 {offsets = [0, 0], sizes = [1, 128], strides = [1, 1]} : vector<8x128xf32> to vector<1x128xf32>
      %34 = arith.addf %30, %33 : vector<1x128xf32>
      %c0_23 = arith.constant 0 : index
      %c0_24 = arith.constant 0 : index
      %35 = vector.load %arg9[%c0_23, %c0_24] : memref<1x128xf32, #tpu.memory_space<vmem>>, vector<1x128xf32>
      tpu.vector_store %arg9[%c0_23, %c0_24], %34 {strides = array<i32>} : memref<1x128xf32, #tpu.memory_space<vmem>>, vector<1x128xf32>,
    } else {
    }
    %c1_i32 = arith.constant 1 : i32
    %8 = arith.cmpi eq, %arg0, %c1_i32 : i32
    %c0_i32_4 = arith.constant 0 : i32
    %9 = arith.cmpi eq, %arg1, %c0_i32_4 : i32
    %10 = arith.andi %8, %9 : i1
    %11 = arith.extui %10 : i1 to i32
    %c0_i32_5 = arith.constant 0 : i32
    %12 = arith.cmpi ne, %11, %c0_i32_5 : i32
    scf.if %12 {
      %c0 = arith.constant 0 : index
      %c0_8 = arith.constant 0 : index
      %16 = vector.load %arg8[%c0, %c0_8] : memref<1x128xf32, #tpu.memory_space<vmem>>, vector<1x128xf32>
      %cst = arith.constant 0.001953125 : f32
      %17 = vector.broadcast %cst : f32 to vector<1x128xf32>
      %18 = arith.mulf %16, %17 : vector<1x128xf32>
      %c0_9 = arith.constant 0 : index
      %c0_10 = arith.constant 0 : index
      %19 = vector.load %arg9[%c0_9, %c0_10] : memref<1x128xf32, #tpu.memory_space<vmem>>, vector<1x128xf32>
      %cst_11 = arith.constant 0.001953125 : f32
      %20 = vector.broadcast %cst_11 : f32 to vector<1x128xf32>
      %21 = arith.mulf %19, %20 : vector<1x128xf32>
      %22 = arith.mulf %18, %18 : vector<1x128xf32>
      %23 = arith.subf %21, %22 : vector<1x128xf32>
      %cst_12 = arith.constant 0.000000e+00 : f32
      %24 = vector.broadcast %cst_12 : f32 to vector<1x128xf32>
      %25 = arith.maximumf %23, %24 : vector<1x128xf32>
      %c0_13 = arith.constant 0 : index
      %c0_14 = arith.constant 0 : index
      %26 = vector.load %arg4[%c0_13, %c0_14] : memref<1x128xf32, #tpu.memory_space<vmem>>, vector<1x128xf32>
      %cst_15 = arith.constant 9.99999974E-6 : f32
      %27 = vector.broadcast %cst_15 : f32 to vector<1x128xf32>
      %28 = arith.addf %25, %27 : vector<1x128xf32>
      %29 = math.rsqrt %28 : vector<1x128xf32>
      %30 = arith.mulf %26, %29 : vector<1x128xf32>
      %c0_16 = arith.constant 0 : index
      %c0_17 = arith.constant 0 : index
      %31 = vector.load %arg5[%c0_16, %c0_17] : memref<1x128xf32, #tpu.memory_space<vmem>>, vector<1x128xf32>
      %32 = arith.mulf %18, %30 : vector<1x128xf32>
      %33 = arith.subf %31, %32 : vector<1x128xf32>
      %c0_18 = arith.constant 0 : index
      %c0_19 = arith.constant 0 : index
      %34 = vector.load %arg8[%c0_18, %c0_19] : memref<1x128xf32, #tpu.memory_space<vmem>>, vector<1x128xf32>
      tpu.vector_store %arg8[%c0_18, %c0_19], %30 {strides = array<i32>} : memref<1x128xf32, #tpu.memory_space<vmem>>, vector<1x128xf32>,
      %c0_20 = arith.constant 0 : index
      %c0_21 = arith.constant 0 : index
      %35 = vector.load %arg9[%c0_20, %c0_21] : memref<1x128xf32, #tpu.memory_space<vmem>>, vector<1x128xf32>
      tpu.vector_store %arg9[%c0_20, %c0_21], %33 {strides = array<i32>} : memref<1x128xf32, #tpu.memory_space<vmem>>, vector<1x128xf32>,
    } else {
    }
    %c1_i32_6 = arith.constant 1 : i32
    %13 = arith.cmpi eq, %arg0, %c1_i32_6 : i32
    %14 = arith.extui %13 : i1 to i32
    %c0_i32_7 = arith.constant 0 : i32
    %15 = arith.cmpi ne, %14, %c0_i32_7 : i32
    scf.if %15 {
      %16 = arith.index_cast %arg1 : i32 to index
      %c0 = arith.constant 0 : index
      %c0_8 = arith.constant 0 : index
      %17 = vector.load %arg7[%16, %c0, %c0_8] : memref<2x256x128xf32, #tpu.memory_space<vmem>>, vector<1x256x128xf32>
      %18 = vector.shape_cast %17 : vector<1x256x128xf32> to vector<256x128xf32>
      %c0_9 = arith.constant 0 : index
      %c0_10 = arith.constant 0 : index
      %19 = vector.load %arg8[%c0_9, %c0_10] : memref<1x128xf32, #tpu.memory_space<vmem>>, vector<1x128xf32>
      %20 = vector.broadcast %19 : vector<1x128xf32> to vector<256x128xf32>
      %21 = arith.mulf %18, %20 : vector<256x128xf32>
      %c0_11 = arith.constant 0 : index
      %c0_12 = arith.constant 0 : index
      %22 = vector.load %arg9[%c0_11, %c0_12] : memref<1x128xf32, #tpu.memory_space<vmem>>, vector<1x128xf32>
      %23 = vector.broadcast %22 : vector<1x128xf32> to vector<256x128xf32>
      %24 = arith.addf %21, %23 : vector<256x128xf32>
      %cst = arith.constant 0.000000e+00 : f32
      %25 = vector.broadcast %cst : f32 to vector<256x128xf32>
      %26 = arith.cmpf oge, %24, %25 : vector<256x128xf32>
      %cst_13 = arith.constant 0.00999999977 : f32
      %27 = vector.broadcast %cst_13 : f32 to vector<256x128xf32>
      %28 = arith.mulf %27, %24 : vector<256x128xf32>
      %29 = arith.select %26, %24, %28 : vector<256x128xi1>, vector<256x128xf32>
      %c0_14 = arith.constant 0 : index
      %c0_15 = arith.constant 0 : index
      %c0_16 = arith.constant 0 : index
      %30 = vector.load %arg6[%c0_14, %c0_15, %c0_16] : memref<1x256x128xf32, #tpu.memory_space<vmem>>, vector<1x256x128xf32>
      %31 = vector.shape_cast %30 : vector<1x256x128xf32> to vector<256x128xf32>
      %32 = vector.shape_cast %29 : vector<256x128xf32> to vector<1x256x128xf32>
      tpu.vector_store %arg6[%c0_14, %c0_15, %c0_16], %32 {strides = array<i32>} : memref<1x256x128xf32, #tpu.memory_space<vmem>>, vector<1x256x128xf32>,
    } else {
    }
    return
  }
  func.func @transform_0(%arg0: i32, %arg1: i32) -> (i32, i32, i32) {
    %c1_i32 = arith.constant 1 : i32
    %0 = arith.subi %c1_i32, %arg0 : i32
    %1 = arith.muli %0, %arg1 : i32
    %c1_i32_0 = arith.constant 1 : i32
    %2 = arith.muli %arg0, %c1_i32_0 : i32
    %3 = arith.addi %1, %2 : i32
    %c0_i32 = arith.constant 0 : i32
    %c0_i32_1 = arith.constant 0 : i32
    %c0_i32_2 = arith.constant 0 : i32
    return %3, %c0_i32, %c0_i32_1 : i32, i32, i32
  }
  func.func @transform_1(%arg0: i32, %arg1: i32) -> (i32, i32) {
    %c0_i32 = arith.constant 0 : i32
    %c0_i32_0 = arith.constant 0 : i32
    %c0_i32_1 = arith.constant 0 : i32
    return %c0_i32, %c0_i32_0 : i32, i32
  }
  func.func @transform_2(%arg0: i32, %arg1: i32) -> (i32, i32) {
    %c0_i32 = arith.constant 0 : i32
    %c0_i32_0 = arith.constant 0 : i32
    %c0_i32_1 = arith.constant 0 : i32
    return %c0_i32, %c0_i32_0 : i32, i32
  }
  func.func @transform_3(%arg0: i32, %arg1: i32) -> (i32, i32) {
    %c0_i32 = arith.constant 0 : i32
    %c0_i32_0 = arith.constant 0 : i32
    %c0_i32_1 = arith.constant 0 : i32
    return %c0_i32, %c0_i32_0 : i32, i32
  }
  func.func @transform_4(%arg0: i32, %arg1: i32) -> (i32, i32, i32) {
    %0 = arith.muli %arg0, %arg1 : i32
    %c0_i32 = arith.constant 0 : i32
    %c0_i32_0 = arith.constant 0 : i32
    %c0_i32_1 = arith.constant 0 : i32
    return %0, %c0_i32, %c0_i32_0 : i32, i32, i32
  }
}

</mosaic_0001>

<bundles_post_ra>
// kernel: conv_batch_lrelu.1
= control target key start
LH: loop header
LB: loop body
LE: loop exit
PB: predicated region body
PF: predicated region fallthrough
CT: control target
= control target key end

     0   :  { %9 = vsyncpa [#allocation6], 0  ;;  %s2358_s0 = inlined_call_operand.vmem [shape: f32[2,256,27], index: 0, kind: input, shape index: {}]   ;;  %s2359_s1 = inlined_call_operand.vmem [shape: f32[27,128], index: 1, kind: input, shape index: {}]   ;;  %s2360_s2 = inlined_call_operand.vmem [shape: f32[1,128], index: 2, kind: input, shape index: {}]   ;;  %s2361_s3 = inlined_call_operand.vmem [shape: f32[1,128], index: 3, kind: input, shape index: {}]   ;;  %s2362_s4 = inlined_call_operand.hbm [shape: f32[2,256,128], index: 4, kind: output, shape index: {}]  }
   0x1   :  { %11 = vsyncpa [#allocation6 + $0x1], 0  ;;  %s1700_s15 = smov 0   ;;  %s1702_s16 = smov 0  }
   0x2   :  { %s1704_s17 = smov 0   ;;  %s1706_s18 = smov 0  }
   0x3   :  { %s1708_s19 = smov 0   ;;  %s1710_s20 = smov 0  }
   0x4   :  { %s1712_s21 = smov 0   ;;  %s1714_s22 = smov 0  }
   0x5 LB: > { %s1205_s23 = sadd.s32 4294967295, %s1667_s22   ;;  %s1206_s24 = sadd.s32 4294967294, %s1667_s22   ;;  %s1667_s22 = sphi %s1714_s22, %s17_s22   ;;  %s1663_s21 = sphi %s1712_s21, %s2371_s21   ;;  %s1659_s20 = sphi %s1710_s20, %s2370_s20   ;;  %s1655_s19 = sphi %s1708_s19, %s2369_s19   ;;  %s1651_s18 = sphi %s1706_s18, %s2368_s18   ;;  %s1647_s17 = sphi %s1704_s17, %s2367_s17   ;;  %s1643_s16 = sphi %s1702_s16, %s2366_s16   ;;  %s1639_s15 = sphi %s1700_s15, %s2365_s15  }
   0x6   : > { %s26_s25 = sadd.s32 1, %s1659_s20  ;;  %s29_s26 = sadd.s32 1, %s1663_s21 }
   0x7   : > { %p27_p0 = scmp.ge.s32.totalorder %s26_s25, 2  ;;  %s128_s27 = smul.u32 %s1659_s20, %s1663_s21 }
   0x8   : > { %p143_p1 = scmp.ne.s32.totalorder %s1647_s17, %s1643_s16  ;;  %p144_p2 = scmp.eq.s32.totalorder %s1205_s23, 3 }
   0x9   : > { %s2373_s25 = smov (%p27_p0, %s26_s25), 0  ;;  %s2375_s26 = smov (!%p27_p0, %s29_s26), %s1663_s21 }
   0xa   : > { %p149_p3 = scmp.ne.s32.totalorder %s1643_s16, %s1639_s15  ;;  %p31_p4 = scmp.ge.s32.totalorder %s2375_s26, 2 }
   0xb   : > { %p150_p5 = scmp.eq.s32.totalorder %s1206_s24, 3  ;;  %p1753_p6 = por %p144_p2, %p143_p1 }
   0xc   : > { %p1209_p7 = scmp.ge.s32.totalorder %s1667_s22, 1  ;;  %s2377_s26 = smov (%p31_p4, %s2375_s26), 0 }
   0xd   : > { %p1760_p8 = por %p150_p5, %p149_p3  ;;  %p191_p9 = scmp.lt.s32.totalorder %s1667_s22, 5 }
   0xe   : > { %s129_s30 = smul.u32 %s2377_s26, %s2373_s25  ;;  %s133_s6 = sadd.s32 1, %s1647_s17 }
   0xf   : > { %p192_p10 = pnand %p1209_p7, %p191_p9 }
  0x10   : > { %s130_s5 = ssub.s32 %s128_s27, %s129_s30  ;;  %s217_s8 = sand.u32 (!%p192_p10), 1, %s1643_s16  }
  0x11   : > { %p131_p11 = scmp.eq.s32.totalorder %s130_s5, 0  ;;  %195 = sbr.rel (%p192_p10) target bundleno = 692 (0x2b4), region = 36 }
  0x12   : > { %s220_s9 = ssub.s32 (!%p192_p10), 1, %s1655_s19  ;;  %s1210_s10 = sshll.u32 (!%p192_p10), %s217_s8, 8 }
  0x13   : > { %s1769_s7 = scalar_select %p131_p11, %s1647_s17, %s133_s6  }
  0x14   : > { %s221_s11 = smul.u32 (!%p192_p10), %s1651_s18, %s220_s9  ;;  %p232_p12 = scmp.eq.s32.totalorder (!%p192_p10), %s1655_s19, 0 }
  0x15   : > { %p233_p13 = scmp.eq.s32.totalorder (!%p192_p10), %s1651_s18, 0  ;;  %s1786_s27 = scalar_lea.vmem (!%p192_p10), [#allocation5], %s1210_s10 }
  0x16   : > { %s222_s12 = sadd.s32 (!%p192_p10), %s1655_s19, %s221_s11 }
  0x17   : > { %p223_p0 = scmp.lt.s32.totalorder (!%p192_p10), %s222_s12, 1  ;;  %p234_p1 = pnand (!%p192_p10), %p233_p13, %p232_p12 }
  0x18   : > { %v1669_v0 = vmov (!%p234_p1), 0.0  }
  0x19   : > { %s2379_s12 = smov (!%p223_p0, %s222_s12), 1  ;;  %237 = sbr.rel (%p234_p1) target bundleno = 43 (0x2b), region = 40 }
  0x1a   : > { %s1257_s13 = sshll.u32 %s2379_s12, 8  ;;  %238 = vst [vmem:[#allocation3] sm:$0x1] (!%p234_p1), %v1669_v0  ;;  %239 = vst [vmem:[#allocation4] sm:$0x1] (!%p234_p1), %v1669_v0 }
  0x1b   : > { %s1784_s24 = scalar_lea.vmem %s2358_s0, %s1257_s13  ;;  %240 = vst [vmem:[%s1786_s27] sm:$0xff] (!%p234_p1), %v1669_v0  ;;  %241 = vst [vmem:[%s1786_s27 + $0x8] sm:$0xff] (!%p234_p1), %v1669_v0 }
  0x1c   : > { %242 = vst [vmem:[%s1786_s27 + $0x10] sm:$0xff] (!%p234_p1), %v1669_v0  ;;  %243 = vst [vmem:[%s1786_s27 + $0x18] sm:$0xff] (!%p234_p1), %v1669_v0 }
  0x1d   : > { %244 = vst [vmem:[%s1786_s27 + $0x20] sm:$0xff] (!%p234_p1), %v1669_v0  ;;  %245 = vst [vmem:[%s1786_s27 + $0x28] sm:$0xff] (!%p234_p1), %v1669_v0 }
  0x1e   : > { %246 = vst [vmem:[%s1786_s27 + $0x30] sm:$0xff] (!%p234_p1), %v1669_v0  ;;  %247 = vst [vmem:[%s1786_s27 + $0x38] sm:$0xff] (!%p234_p1), %v1669_v0 }
  0x1f   : > { %248 = vst [vmem:[%s1786_s27 + $0x40] sm:$0xff] (!%p234_p1), %v1669_v0  ;;  %249 = vst [vmem:[%s1786_s27 + $0x48] sm:$0xff] (!%p234_p1), %v1669_v0 }
  0x20   : > { %250 = vst [vmem:[%s1786_s27 + $0x50] sm:$0xff] %v1669_v0  ;;  %251 = vst [vmem:[%s1786_s27 + $0x58] sm:$0xff] %v1669_v0 }
  0x21   : > { %252 = vst [vmem:[%s1786_s27 + $0x60] sm:$0xff] %v1669_v0  ;;  %253 = vst [vmem:[%s1786_s27 + $0x68] sm:$0xff] %v1669_v0 }
  0x22   : > { %254 = vst [vmem:[%s1786_s27 + $0x70] sm:$0xff] %v1669_v0  ;;  %255 = vst [vmem:[%s1786_s27 + $0x78] sm:$0xff] %v1669_v0 }
  0x23   : > { %256 = vst [vmem:[%s1786_s27 + $0x80] sm:$0xff] %v1669_v0  ;;  %257 = vst [vmem:[%s1786_s27 + $0x88] sm:$0xff] %v1669_v0 }
  0x24   : > { %258 = vst [vmem:[%s1786_s27 + $0x90] sm:$0xff] %v1669_v0  ;;  %259 = vst [vmem:[%s1786_s27 + $0x98] sm:$0xff] %v1669_v0 }
  0x25   : > { %260 = vst [vmem:[%s1786_s27 + $0xa0] sm:$0xff] %v1669_v0  ;;  %261 = vst [vmem:[%s1786_s27 + $0xa8] sm:$0xff] %v1669_v0 }
  0x26   : > { %262 = vst [vmem:[%s1786_s27 + $0xb0] sm:$0xff] %v1669_v0  ;;  %263 = vst [vmem:[%s1786_s27 + $0xb8] sm:$0xff] %v1669_v0 }
  0x27   : > { %264 = vst [vmem:[%s1786_s27 + $0xc0] sm:$0xff] %v1669_v0  ;;  %265 = vst [vmem:[%s1786_s27 + $0xc8] sm:$0xff] %v1669_v0 }
  0x28   : > { %266 = vst [vmem:[%s1786_s27 + $0xd0] sm:$0xff] %v1669_v0  ;;  %267 = vst [vmem:[%s1786_s27 + $0xd8] sm:$0xff] %v1669_v0 }
  0x29   : > { %268 = vst [vmem:[%s1786_s27 + $0xe0] sm:$0xff] %v1669_v0  ;;  %269 = vst [vmem:[%s1786_s27 + $0xe8] sm:$0xff] %v1669_v0 }
  0x2a   : > { %270 = vst [vmem:[%s1786_s27 + $0xf0] sm:$0xff] %v1669_v0  ;;  %271 = vst [vmem:[%s1786_s27 + $0xf8] sm:$0xff] %v1669_v0 }
  0x2b PF: > { %p1213_p2 = scmp.ne.s32.totalorder %s1655_s19, 0 }
  0x2c   : > { %v307_v1 = vld [vmem:[%s2359_s1] sm:$0xff] (!%p1213_p2)  ;;  %v308_v2 = vld [vmem:[%s2359_s1 + $0x8] sm:$0xff] (!%p1213_p2)  ;;  %v309_v3 = vld [vmem:[%s2359_s1 + $0x10] sm:$0xff] (!%p1213_p2)  ;;  %vm408_vm0 = vcmask (!%p1213_p2), 1042432   ;;  %vm311_vm1 = vcmask (!%p1213_p2), 220160   ;;  %vm1670_vm2 = vmmov (!%p1213_p2), 1  }
  0x2d   : > { %274 = sbr.rel (%p1213_p2) target bundleno = 584 (0x248), region = 44  ;;  %v1421_v4 = vpack.c.bf16 (!%p1213_p2), %v308_v2, %v307_v1  ;;  %v310_v5 = vld [vmem:[%s2359_s1 + $0x18] sm:$0x7] (!%p1213_p2)  ;;  %v275_v6 = vld [vmem:[%s1784_s24] sm:$0xff] (!%p1213_p2)  ;;  %vm1426_vm3 = vmpackc.low (!%p1213_p2), %vm408_vm0, %vm1670_vm2  ;;  %v1671_v39 = vmov (!%p1213_p2), 1.0   ;;  %s1247_s14 = sshll.u32 (!%p1213_p2), %s1651_s18, 8 }
  0x2e   : > { %v1425_v7 = vpack.c.bf16 (!%p1213_p2), %v310_v5, %v309_v3  ;;  %1373 = vmatprep.mubr.msk.f32.mxu0 (!%p1213_p2), %vm311_vm1, %v275_v6  ;;  %v276_v8 = vld [vmem:[%s1784_s24 + $0x8] sm:$0xff] (!%p1213_p2)  ;;  %v277_v9 = vld [vmem:[%s1784_s24 + $0x10] sm:$0xff] (!%p1213_p2)  ;;  %v278_v10 = vld [vmem:[%s1784_s24 + $0x18] sm:$0xff] (!%p1213_p2)  ;;  %736 = vmatprep.mubr.f32.mxu1 (!%p1213_p2), %v1671_v39  ;;  %s1901_s23 = scalar_lea.vmem (!%p1213_p2), [#allocation2], %s1247_s14 }
  0x2f   : > { %1422 = vmatprep.subr.bf16.mxu0 (!%p1213_p2), %v1421_v4  ;;  %v279_v11 = vld [vmem:[%s1784_s24 + $0x20] sm:$0xff] (!%p1213_p2)  ;;  %v280_v12 = vld [vmem:[%s1784_s24 + $0x28] sm:$0xff] (!%p1213_p2)  ;;  %v281_v13 = vld [vmem:[%s1784_s24 + $0x30] sm:$0xff] (!%p1213_p2) }
  0x30   : > { %1424 = vmatpush3.bf16.msra.mxu0 (!%p1213_p2), %v1421_v4  ;;  %v282_v14 = vld [vmem:[%s1784_s24 + $0x38] sm:$0xff] (!%p1213_p2)  ;;  %v283_v15 = vld [vmem:[%s1784_s24 + $0x40] sm:$0xff] (!%p1213_p2)  ;;  %v284_v16 = vld [vmem:[%s1784_s24 + $0x48] sm:$0xff] (!%p1213_p2) }
  0x31   : > { %1427 = vmatprep.subr.msk.bf16.mxu0 (!%p1213_p2), %vm1426_vm3, %v1425_v7  ;;  %v285_v17 = vld [vmem:[%s1784_s24 + $0x50] sm:$0xff] (!%p1213_p2)  ;;  %v286_v18 = vld [vmem:[%s1784_s24 + $0x58] sm:$0xff] (!%p1213_p2)  ;;  %v287_v19 = vld [vmem:[%s1784_s24 + $0x60] sm:$0xff] (!%p1213_p2) }
  0x32   : > { %v288_v20 = vld [vmem:[%s1784_s24 + $0x68] sm:$0xff] (!%p1213_p2)  ;;  %v289_v21 = vld [vmem:[%s1784_s24 + $0x70] sm:$0xff] (!%p1213_p2)  ;;  %v290_v22 = vld [vmem:[%s1784_s24 + $0x78] sm:$0xff] (!%p1213_p2) }
  0x33   : > { %v291_v23 = vld [vmem:[%s1784_s24 + $0x80] sm:$0xff] (!%p1213_p2)  ;;  %v292_v24 = vld [vmem:[%s1784_s24 + $0x88] sm:$0xff] (!%p1213_p2)  ;;  %v293_v25 = vld [vmem:[%s1784_s24 + $0x90] sm:$0xff] (!%p1213_p2) }
  0x34   : > { %1430 = vmatpush3.bf16.msk.msra.mxu0 %vm1426_vm3, %v1425_v7  ;;  %v294_v26 = vld [vmem:[%s1784_s24 + $0x98] sm:$0xff]  ;;  %v295_v27 = vld [vmem:[%s1784_s24 + $0xa0] sm:$0xff]  ;;  %v296_v28 = vld [vmem:[%s1784_s24 + $0xa8] sm:$0xff] }
  0x35   : > { %v297_v29 = vld [vmem:[%s1784_s24 + $0xb0] sm:$0xff]  ;;  %v298_v30 = vld [vmem:[%s1784_s24 + $0xb8] sm:$0xff]  ;;  %v299_v31 = vld [vmem:[%s1784_s24 + $0xc0] sm:$0xff] }
  0x36   : > { %v300_v32 = vld [vmem:[%s1784_s24 + $0xc8] sm:$0xff]  ;;  %v301_v33 = vld [vmem:[%s1784_s24 + $0xd0] sm:$0xff]  ;;  %v302_v34 = vld [vmem:[%s1784_s24 + $0xd8] sm:$0xff] }
  0x37   : > { %1374 = vmatmul.mubr.msk.f32.vlgmr.msra.gmra.mrb[0].mxu0 %vm311_vm1, %v276_v8  ;;  %v303_v35 = vld [vmem:[%s1784_s24 + $0xe0] sm:$0xff]  ;;  %v304_v36 = vld [vmem:[%s1784_s24 + $0xe8] sm:$0xff]  ;;  %v305_v37 = vld [vmem:[%s1784_s24 + $0xf0] sm:$0xff] }
  0x38   : > { %1376 = vmatprep.mubr.msk.f32.mxu0 %vm311_vm1, %v277_v9  ;;  %v306_v38 = vld [vmem:[%s1784_s24 + $0xf8] sm:$0xff] }
  0x3b   : > { %1377 = vmatmul.mubr.msk.f32.gmra.mrb[2].mxu0 %vm311_vm1, %v278_v10 }
  0x3c   : > { %1379 = vmatprep.mubr.msk.f32.mxu0 %vm311_vm1, %v279_v11 }
  0x3f   : > { %1380 = vmatmul.mubr.msk.f32.gmra.mrb[4].mxu0 %vm311_vm1, %v280_v12 }
  0x40   : > { %1382 = vmatprep.mubr.msk.f32.mxu0 %vm311_vm1, %v281_v13 }
  0x43   : > { %1383 = vmatmul.mubr.msk.f32.gmra.mrb[6].mxu0 %vm311_vm1, %v282_v14 }
  0x44   : > { %1385 = vmatprep.mubr.msk.f32.mxu0 %vm311_vm1, %v283_v15 }
  0x47   : > { %1386 = vmatmul.mubr.msk.f32.gmra.mrb[8].mxu0 %vm311_vm1, %v284_v16 }
  0x48   : > { %1388 = vmatprep.mubr.msk.f32.mxu0 %vm311_vm1, %v285_v17 }
  0x4b   : > { %1389 = vmatmul.mubr.msk.f32.gmra.mrb[10].mxu0 %vm311_vm1, %v286_v18 }
  0x4c   : > { %1391 = vmatprep.mubr.msk.f32.mxu0 %vm311_vm1, %v287_v19 }
  0x4f   : > { %1392 = vmatmul.mubr.msk.f32.gmra.mrb[12].mxu0 %vm311_vm1, %v288_v20 }
  0x50   : > { %1394 = vmatprep.mubr.msk.f32.mxu0 %vm311_vm1, %v289_v21 }
  0x53   : > { %1395 = vmatmul.mubr.msk.f32.gmra.mrb[14].mxu0 %vm311_vm1, %v290_v22 }
  0x54   : > { %1397 = vmatprep.mubr.msk.f32.mxu0 %vm311_vm1, %v291_v23 }
  0x57   : > { %1398 = vmatmul.mubr.msk.f32.gmra.mrb[16].mxu0 %vm311_vm1, %v292_v24 }
  0x58   : > { %1400 = vmatprep.mubr.msk.f32.mxu0 %vm311_vm1, %v293_v25 }
  0x5b   : > { %1401 = vmatmul.mubr.msk.f32.gmra.mrb[18].mxu0 %vm311_vm1, %v294_v26 }
  0x5c   : > { %1403 = vmatprep.mubr.msk.f32.mxu0 %vm311_vm1, %v295_v27 }
  0x5f   : > { %1404 = vmatmul.mubr.msk.f32.gmra.mrb[20].mxu0 %vm311_vm1, %v296_v28 }
  0x60   : > { %1406 = vmatprep.mubr.msk.f32.mxu0 %vm311_vm1, %v297_v29 }
  0x63   : > { %1407 = vmatmul.mubr.msk.f32.gmra.mrb[22].mxu0 %vm311_vm1, %v298_v30 }
  0x64   : > { %1409 = vmatprep.mubr.msk.f32.mxu0 %vm311_vm1, %v299_v31 }
  0x67   : > { %1410 = vmatmul.mubr.msk.f32.gmra.mrb[24].mxu0 %vm311_vm1, %v300_v32 }
  0x68   : > { %1412 = vmatprep.mubr.msk.f32.mxu0 %vm311_vm1, %v301_v33 }
  0x6b   : > { %1413 = vmatmul.mubr.msk.f32.gmra.mrb[26].mxu0 %vm311_vm1, %v302_v34 }
  0x6c   : > { %1415 = vmatprep.mubr.msk.f32.mxu0 %vm311_vm1, %v303_v35 }
  0x6f   : > { %1416 = vmatmul.mubr.msk.f32.gmra.mrb[28].mxu0 %vm311_vm1, %v304_v36 }
  0x70   : > { %1418 = vmatprep.mubr.msk.f32.mxu0 %vm311_vm1, %v305_v37 }
  0x73   : > { %1419 = vmatmul.mubr.msk.f32.gmra.mrb[30].mxu0 %vm311_vm1, %v306_v38 }
 0x10a   : > { %v1899_v40 = vpop.f32.mrb[0].mxu0 }
 0x10b   : > { %640 = vst [vmem:[%s1901_s23 + $0x8] sm:$0xff] %v1899_v40  ;;  %v1907_v41 = vmul.f32 %v1899_v40, %v1899_v40  ;;  %v1909_v42 = vpop.f32.mrb[1].mxu0 }
 0x10c   : > { %639 = vst [vmem:[%s1901_s23] sm:$0xff] %v1909_v42  ;;  %v1915_v43 = vmul.f32 %v1909_v42, %v1909_v42  ;;  %v1433_v44 = vpack.c.bf16 %v1899_v40, %v1909_v42 }
 0x10e   : > { %v1465_v45 = vpack.c.bf16 %v1907_v41, %v1915_v43  ;;  %v1921_v46 = vpop.f32.mrb[2].mxu0  ;;  %v671_v43 = vld [vmem:[#allocation3] sm:$0x1] }
 0x10f   : > { %642 = vst [vmem:[%s1901_s23 + $0x18] sm:$0xff] %v1921_v46  ;;  %v1927_v47 = vmul.f32 %v1921_v46, %v1921_v46  ;;  %v1929_v48 = vpop.f32.mrb[3].mxu0 }
 0x110   : > { %641 = vst [vmem:[%s1901_s23 + $0x10] sm:$0xff] %v1929_v48  ;;  %v1437_v49 = vpack.c.bf16 %v1921_v46, %v1929_v48  ;;  %v1937_v50 = vmul.f32 %v1929_v48, %v1929_v48 }
 0x112   : > { %v1469_v51 = vpack.c.bf16 %v1927_v47, %v1937_v50  ;;  %v1941_v52 = vpop.f32.mrb[4].mxu0 }
 0x113   : > { %644 = vst [vmem:[%s1901_s23 + $0x28] sm:$0xff] %v1941_v52  ;;  %v1947_v53 = vmul.f32 %v1941_v52, %v1941_v52  ;;  %v1949_v54 = vpop.f32.mrb[5].mxu0 }
 0x114   : > { %643 = vst [vmem:[%s1901_s23 + $0x20] sm:$0xff] %v1949_v54  ;;  %v1441_v55 = vpack.c.bf16 %v1941_v52, %v1949_v54  ;;  %v1957_v56 = vmul.f32 %v1949_v54, %v1949_v54 }
 0x116   : > { %v1473_v57 = vpack.c.bf16 %v1947_v53, %v1957_v56  ;;  %v1961_v58 = vpop.f32.mrb[6].mxu0  ;;  %v744_v53 = vld [vmem:[#allocation4] sm:$0x1] }
 0x117   : > { %646 = vst [vmem:[%s1901_s23 + $0x38] sm:$0xff] %v1961_v58  ;;  %v1967_v59 = vmul.f32 %v1961_v58, %v1961_v58  ;;  %v1969_v60 = vpop.f32.mrb[7].mxu0 }
 0x118   : > { %645 = vst [vmem:[%s1901_s23 + $0x30] sm:$0xff] %v1969_v60  ;;  %v1445_v61 = vpack.c.bf16 %v1961_v58, %v1969_v60  ;;  %v1977_v62 = vmul.f32 %v1969_v60, %v1969_v60 }
 0x11a   : > { %v1477_v63 = vpack.c.bf16 %v1967_v59, %v1977_v62  ;;  %v1981_v0 = vpop.f32.mrb[8].mxu0 }
 0x11b   : > { %648 = vst [vmem:[%s1901_s23 + $0x48] sm:$0xff] %v1981_v0  ;;  %v1987_v1 = vmul.f32 %v1981_v0, %v1981_v0  ;;  %v1989_v2 = vpop.f32.mrb[9].mxu0 }
 0x11c   : > { %647 = vst [vmem:[%s1901_s23 + $0x40] sm:$0xff] %v1989_v2  ;;  %v1449_v3 = vpack.c.bf16 %v1981_v0, %v1989_v2  ;;  %v1997_v4 = vmul.f32 %v1989_v2, %v1989_v2 }
 0x11e   : > { %v1481_v5 = vpack.c.bf16 %v1987_v1, %v1997_v4  ;;  %v2001_v6 = vpop.f32.mrb[10].mxu0 }
 0x11f   : > { %650 = vst [vmem:[%s1901_s23 + $0x58] sm:$0xff] %v2001_v6  ;;  %v2007_v7 = vmul.f32 %v2001_v6, %v2001_v6  ;;  %v2009_v8 = vpop.f32.mrb[11].mxu0 }
 0x120   : > { %649 = vst [vmem:[%s1901_s23 + $0x50] sm:$0xff] %v2009_v8  ;;  %v1453_v9 = vpack.c.bf16 %v2001_v6, %v2009_v8  ;;  %v2017_v10 = vmul.f32 %v2009_v8, %v2009_v8 }
 0x122   : > { %v1485_v11 = vpack.c.bf16 %v2007_v7, %v2017_v10  ;;  %v2021_v12 = vpop.f32.mrb[12].mxu0 }
 0x123   : > { %652 = vst [vmem:[%s1901_s23 + $0x68] sm:$0xff] %v2021_v12  ;;  %v2027_v13 = vmul.f32 %v2021_v12, %v2021_v12  ;;  %v2029_v14 = vpop.f32.mrb[13].mxu0 }
 0x124   : > { %651 = vst [vmem:[%s1901_s23 + $0x60] sm:$0xff] %v2029_v14  ;;  %v1457_v15 = vpack.c.bf16 %v2021_v12, %v2029_v14  ;;  %v2037_v16 = vmul.f32 %v2029_v14, %v2029_v14 }
 0x126   : > { %v1489_v17 = vpack.c.bf16 %v2027_v13, %v2037_v16  ;;  %v2041_v18 = vpop.f32.mrb[14].mxu0 }
 0x127   : > { %654 = vst [vmem:[%s1901_s23 + $0x78] sm:$0xff] %v2041_v18  ;;  %v2047_v19 = vmul.f32 %v2041_v18, %v2041_v18  ;;  %v2049_v20 = vpop.f32.mrb[15].mxu0 }
 0x128   : > { %653 = vst [vmem:[%s1901_s23 + $0x70] sm:$0xff] %v2049_v20  ;;  %v1461_v21 = vpack.c.bf16 %v2041_v18, %v2049_v20  ;;  %v2057_v22 = vmul.f32 %v2049_v20, %v2049_v20 }
 0x12a   : > { %v1493_v23 = vpack.c.bf16 %v2047_v19, %v2057_v22  ;;  %v1399_v24 = vpop.f32.mrb[16].mxu0 }
 0x12b   : > { %656 = vst [vmem:[%s1901_s23 + $0x88] sm:$0xff] %v1399_v24  ;;  %v2062_v25 = vmul.f32 %v1399_v24, %v1399_v24  ;;  %v558_v26 = vpop.f32.mrb[17].mxu0 }
 0x12c   : > { %655 = vst [vmem:[%s1901_s23 + $0x80] sm:$0xff] %v558_v26  ;;  %v2065_v27 = vmul.f32 %v558_v26, %v558_v26  ;;  %v1431_v28 = vpack.c.bf16 %v1399_v24, %v558_v26 }
 0x12e   : > { %v1402_v29 = vpop.f32.mrb[18].mxu0  ;;  %1432 = vmatprep.subr.bf16.mxu1 %v1431_v28  ;;  %v1463_v30 = vpack.c.bf16 %v2062_v25, %v2065_v27 }
 0x12f   : > { %658 = vst [vmem:[%s1901_s23 + $0x98] sm:$0xff] %v1402_v29  ;;  %v2070_v31 = vmul.f32 %v1402_v29, %v1402_v29  ;;  %v568_v32 = vpop.f32.mrb[19].mxu0  ;;  %1434 = vmatpush3.bf16.msra.mxu1 %v1433_v44 }
 0x130   : > { %657 = vst [vmem:[%s1901_s23 + $0x90] sm:$0xff] %v568_v32  ;;  %v1435_v33 = vpack.c.bf16 %v1402_v29, %v568_v32  ;;  %v2076_v34 = vmul.f32 %v568_v32, %v568_v32 }
 0x132   : > { %v1405_v35 = vpop.f32.mrb[20].mxu0  ;;  %1436 = vmatprep.subr.bf16.mxu1 %v1435_v33  ;;  %v1467_v36 = vpack.c.bf16 %v2070_v31, %v2076_v34 }
 0x133   : > { %660 = vst [vmem:[%s1901_s23 + $0xa8] sm:$0xff] %v1405_v35  ;;  %v2081_v37 = vmul.f32 %v1405_v35, %v1405_v35  ;;  %v578_v38 = vpop.f32.mrb[21].mxu0  ;;  %1438 = vmatpush3.bf16.msra.mxu1 %v1437_v49 }
 0x134   : > { %659 = vst [vmem:[%s1901_s23 + $0xa0] sm:$0xff] %v578_v38  ;;  %v1439_v40 = vpack.c.bf16 %v1405_v35, %v578_v38  ;;  %v765_v42 = vmul.f32 %v578_v38, %v578_v38 }
 0x136   : > { %v1408_v44 = vpop.f32.mrb[22].mxu0  ;;  %1440 = vmatprep.subr.bf16.mxu1 %v1439_v40  ;;  %v1471_v24 = vpack.c.bf16 %v2081_v37, %v765_v42 }
 0x137   : > { %662 = vst [vmem:[%s1901_s23 + $0xb8] sm:$0xff] %v1408_v44  ;;  %v768_v26 = vmul.f32 %v1408_v44, %v1408_v44  ;;  %v588_v28 = vpop.f32.mrb[23].mxu0  ;;  %1442 = vmatpush3.bf16.msra.mxu1 %v1441_v55 }
 0x138   : > { %661 = vst [vmem:[%s1901_s23 + $0xb0] sm:$0xff] %v588_v28  ;;  %v1443_v46 = vpack.c.bf16 %v1408_v44, %v588_v28  ;;  %v767_v48 = vmul.f32 %v588_v28, %v588_v28 }
 0x13a   : > { %v1411_v49 = vpop.f32.mrb[24].mxu0  ;;  %1444 = vmatprep.subr.bf16.mxu1 %v1443_v46  ;;  %v1475_v29 = vpack.c.bf16 %v768_v26, %v767_v48 }
 0x13b   : > { %664 = vst [vmem:[%s1901_s23 + $0xc8] sm:$0xff] %v1411_v49  ;;  %v770_v32 = vmul.f32 %v1411_v49, %v1411_v49  ;;  %v598_v33 = vpop.f32.mrb[25].mxu0  ;;  %1446 = vmatpush3.bf16.msra.mxu1 %v1445_v61 }
 0x13c   : > { %663 = vst [vmem:[%s1901_s23 + $0xc0] sm:$0xff] %v598_v33  ;;  %v1447_v35 = vpack.c.bf16 %v1411_v49, %v598_v33  ;;  %v769_v52 = vmul.f32 %v598_v33, %v598_v33 }
 0x13e   : > { %v1414_v54 = vpop.f32.mrb[26].mxu0  ;;  %1448 = vmatprep.subr.bf16.mxu1 %v1447_v35  ;;  %v1479_v55 = vpack.c.bf16 %v770_v32, %v769_v52 }
 0x13f   : > { %666 = vst [vmem:[%s1901_s23 + $0xd8] sm:$0xff] %v1414_v54  ;;  %v772_v37 = vmul.f32 %v1414_v54, %v1414_v54  ;;  %v608_v38 = vpop.f32.mrb[27].mxu0  ;;  %1450 = vmatpush3.bf16.msra.mxu1 %v1449_v3 }
 0x140   : > { %665 = vst [vmem:[%s1901_s23 + $0xd0] sm:$0xff] %v608_v38  ;;  %v1451_v40 = vpack.c.bf16 %v1414_v54, %v608_v38  ;;  %v771_v58 = vmul.f32 %v608_v38, %v608_v38 }
 0x142   : > { %v1417_v60 = vpop.f32.mrb[28].mxu0  ;;  %1452 = vmatprep.subr.bf16.mxu1 %v1451_v40  ;;  %v1483_v61 = vpack.c.bf16 %v772_v37, %v771_v58 }
 0x143   : > { %668 = vst [vmem:[%s1901_s23 + $0xe8] sm:$0xff] %v1417_v60  ;;  %v774_v42 = vmul.f32 %v1417_v60, %v1417_v60  ;;  %v618_v44 = vpop.f32.mrb[29].mxu0  ;;  %1454 = vmatpush3.bf16.msra.mxu1 %v1453_v9 }
 0x144   : > { %667 = vst [vmem:[%s1901_s23 + $0xe0] sm:$0xff] %v618_v44  ;;  %v1455_v26 = vpack.c.bf16 %v1417_v60, %v618_v44  ;;  %v773_v28 = vmul.f32 %v618_v44, %v618_v44 }
 0x146   : > { %v1420_v0 = vpop.f32.mrb[30].mxu0  ;;  %1456 = vmatprep.subr.bf16.mxu1 %v1455_v26  ;;  %v1487_v2 = vpack.c.bf16 %v774_v42, %v773_v28 }
 0x147   : > { %670 = vst [vmem:[%s1901_s23 + $0xf8] sm:$0xff] %v1420_v0  ;;  %v776_v3 = vmul.f32 %v1420_v0, %v1420_v0  ;;  %v628_v46 = vpop.f32.mrb[31].mxu0  ;;  %1458 = vmatpush3.bf16.msra.mxu1 %v1457_v15 }
 0x148   : > { %669 = vst [vmem:[%s1901_s23 + $0xf0] sm:$0xff] %v628_v46  ;;  %v1459_v48 = vpack.c.bf16 %v1420_v0, %v628_v46  ;;  %v775_v49 = vmul.f32 %v628_v46, %v628_v46 }
 0x14a   : > { %v1491_v32 = vpack.c.bf16 %v776_v3, %v775_v49  ;;  %1460 = vmatprep.subr.bf16.mxu1 %v1459_v48 }
 0x14b   : > { %1462 = vmatpush3.bf16.msra.mxu1 %v1461_v21 }
 0x14c   : > { %1464 = vmatprep.subr.bf16.mxu1 %v1463_v30 }
 0x14e   : > { %737 = vmatmul.mubr.f32.vlgmr.msra.gmra.mrb[0].mxu1 %v1671_v39 }
 0x14f   : > { %1466 = vmatpush3.bf16.msra.mxu1 %v1465_v45  ;;  %841 = vmatprep.mubr.f32.mxu1 %v1671_v39 }
 0x150   : > { %1468 = vmatprep.subr.bf16.mxu1 %v1467_v36 }
 0x153   : > { %1470 = vmatpush3.bf16.msra.mxu1 %v1469_v51 }
 0x154   : > { %1472 = vmatprep.subr.bf16.mxu1 %v1471_v24 }
 0x157   : > { %1474 = vmatpush3.bf16.msra.mxu1 %v1473_v57 }
 0x158   : > { %1476 = vmatprep.subr.bf16.mxu1 %v1475_v29 }
 0x15b   : > { %1478 = vmatpush3.bf16.msra.mxu1 %v1477_v63 }
 0x15c   : > { %1480 = vmatprep.subr.bf16.mxu1 %v1479_v55 }
 0x15f   : > { %1482 = vmatpush3.bf16.msra.mxu1 %v1481_v5 }
 0x160   : > { %1484 = vmatprep.subr.bf16.mxu1 %v1483_v61 }
 0x163   : > { %1486 = vmatpush3.bf16.msra.mxu1 %v1485_v11 }
 0x164   : > { %1488 = vmatprep.subr.bf16.mxu1 %v1487_v2 }
 0x167   : > { %1490 = vmatpush3.bf16.msra.mxu1 %v1489_v17 }
 0x168   : > { %1492 = vmatprep.subr.bf16.mxu1 %v1491_v32 }
 0x16b   : > { %1494 = vmatpush3.bf16.msra.mxu1 %v1493_v23 }
 0x16e   : > { %842 = vmatmul.mubr.f32.vlgmr.msra.gmra.mrb[2].mxu1 %v1671_v39 }
 0x221   : > { %v1327_v41 = vpop.f32.mrb[0].mxu1 }
 0x222   : > { %v1328_v45 = vpop.f32.mrb[1].mxu1 }
 0x223   : > { %v1329_v47 = vadd.f32 %v1328_v45, %v1327_v41 }
 0x225   : > { %v742_v50 = vadd.f32 %v1329_v47, %v671_v43 }
 0x227   : > { %743 = vst [vmem:[#allocation3] sm:$0x1] %v742_v50 }
 0x241   : > { %v1362_v51 = vpop.f32.mrb[2].mxu1 }
 0x242   : > { %v1363_v56 = vpop.f32.mrb[3].mxu1 }
 0x243   : > { %v1364_v57 = vadd.f32 %v1363_v56, %v1362_v51 }
 0x245   : > { %v847_v59 = vadd.f32 %v1364_v57, %v744_v53 }
 0x247   : > { %848 = vst [vmem:[#allocation4] sm:$0x1] %v847_v59 }
 0x248 PF: > { %p849_p3 = scmp.eq.s32.totalorder %s1655_s19, 1 }
 0x24a   : > { %p850_p4 = pnand %p849_p3, %p233_p13 }
 0x24b   : > { %v854_v39 = vld [vmem:[#allocation3] sm:$0x1] (!%p850_p4) }
 0x24c   : > { %853 = sbr.rel (%p850_p4) target bundleno = 617 (0x269), region = 48  ;;  %v855_v63 = vmul.f32 (!%p850_p4), 0.001953125, %v854_v39  ;;  %v861_v8 = vld [vmem:[%s2360_s2] sm:$0x1] (!%p850_p4) }
 0x24d   : > { %v865_v11 = vld [vmem:[%s2361_s3] sm:$0x1] (!%p850_p4) }
 0x24e   : > { %v856_v62 = vld [vmem:[#allocation4] sm:$0x1] (!%p850_p4)  ;;  %v858_v4 = vmul.f32 (!%p850_p4), %v855_v63, %v855_v63 }
 0x24f   : > { %v857_v1 = vmul.f32 (!%p850_p4), 0.001953125, %v856_v62 }
 0x251   : > { %v859_v5 = vsub.f32 (!%p850_p4), %v857_v1, %v858_v4 }
 0x253   : > { %v860_v6 = vmax.f32 %v859_v5, 0.0 }
 0x255   : > { %v862_v7 = vadd.f32 1e-05, %v860_v6 }
 0x257   : > { %1571 = vrsqrt.f32 %v862_v7 }
 0x261   : > { %v1572_v9 = vpop.eup %1571 }
 0x262   : > { %v864_v10 = vmul.f32 %v1572_v9, %v861_v8 }
 0x264   : > { %868 = vst [vmem:[#allocation3] sm:$0x1] %v864_v10  ;;  %v866_v12 = vmul.f32 %v864_v10, %v855_v63 }
 0x266   : > { %v867_v13 = vsub.f32 %v865_v11, %v866_v12 }
 0x268   : > { %869 = vst [vmem:[#allocation4] sm:$0x1] %v867_v13 }
 0x269 PF: > { %p1248_p5 = scmp.ne.s32.totalorder %s1655_s19, 1 }
 0x26a   : > { %s1249_s9 = sshll.u32 (!%p1248_p5), %s1651_s18, 8 }
 0x26b   : > { %872 = sbr.rel (%p1248_p5) target bundleno = 666 (0x29a), region = 52  ;;  %v2160_v14 = vld [vmem:[#allocation3] ss:$0 sm:$0xff] (!%p1248_p5)  ;;  %s2164_s10 = scalar_lea.vmem (!%p1248_p5), [#allocation2], %s1249_s9 }
 0x26c   : > { %v875_v16 = vld [vmem:[%s2164_s10] sm:$0xff] (!%p1248_p5)  ;;  %v876_v17 = vld [vmem:[%s2164_s10 + $0x8] sm:$0xff] (!%p1248_p5)  ;;  %v877_v18 = vld [vmem:[%s2164_s10 + $0x10] sm:$0xff] (!%p1248_p5) }
 0x26d   : > { %v914_v19 = vmul.f32 (!%p1248_p5), %v2160_v14, %v875_v16  ;;  %v915_v20 = vmul.f32 (!%p1248_p5), %v2160_v14, %v876_v17  ;;  %v916_v21 = vmul.f32 (!%p1248_p5), %v2160_v14, %v877_v18  ;;  %v878_v22 = vld [vmem:[%s2164_s10 + $0x18] sm:$0xff] (!%p1248_p5)  ;;  %v879_v23 = vld [vmem:[%s2164_s10 + $0x20] sm:$0xff] (!%p1248_p5)  ;;  %v880_v25 = vld [vmem:[%s2164_s10 + $0x28] sm:$0xff] (!%p1248_p5) }
 0x26e   : > { %v917_v27 = vmul.f32 (!%p1248_p5), %v2160_v14, %v878_v22  ;;  %v918_v30 = vmul.f32 (!%p1248_p5), %v2160_v14, %v879_v23  ;;  %v919_v31 = vmul.f32 (!%p1248_p5), %v2160_v14, %v880_v25  ;;  %v881_v34 = vld [vmem:[%s2164_s10 + $0x30] sm:$0xff] (!%p1248_p5)  ;;  %v882_v36 = vld [vmem:[%s2164_s10 + $0x38] sm:$0xff] (!%p1248_p5)  ;;  %v883_v38 = vld [vmem:[%s2164_s10 + $0x40] sm:$0xff] (!%p1248_p5) }
 0x26f   : > { %v2162_v15 = vld [vmem:[#allocation4] ss:$0 sm:$0xff] (!%p1248_p5)  ;;  %v920_v35 = vmul.f32 (!%p1248_p5), %v2160_v14, %v881_v34  ;;  %v921_v37 = vmul.f32 (!%p1248_p5), %v2160_v14, %v882_v36  ;;  %v884_v28 = vld [vmem:[%s2164_s10 + $0x48] sm:$0xff] (!%p1248_p5)  ;;  %v885_v0 = vld [vmem:[%s2164_s10 + $0x50] sm:$0xff] (!%p1248_p5)  ;;  %v922_v43 = vmul.f32 (!%p1248_p5), %v2160_v14, %v883_v38 }
 0x270   : > { %v953_v24 = vadd.f32 (!%p1248_p5), %v2162_v15, %v914_v19  ;;  %v954_v29 = vadd.f32 (!%p1248_p5), %v2162_v15, %v915_v20  ;;  %v955_v33 = vadd.f32 (!%p1248_p5), %v2162_v15, %v916_v21  ;;  %v956_v52 = vadd.f32 (!%p1248_p5), %v2162_v15, %v917_v27  ;;  %v886_v2 = vld [vmem:[%s2164_s10 + $0x58] sm:$0xff] (!%p1248_p5)  ;;  %v887_v53 = vld [vmem:[%s2164_s10 + $0x60] sm:$0xff] (!%p1248_p5)  ;;  %v888_v56 = vld [vmem:[%s2164_s10 + $0x68] sm:$0xff] (!%p1248_p5) }
 0x271   : > { %v957_v54 = vadd.f32 (!%p1248_p5), %v2162_v15, %v918_v30  ;;  %v958_v55 = vadd.f32 (!%p1248_p5), %v2162_v15, %v919_v31  ;;  %v959_v32 = vadd.f32 (!%p1248_p5), %v2162_v15, %v920_v35  ;;  %v960_v41 = vadd.f32 (!%p1248_p5), %v2162_v15, %v921_v37  ;;  %v889_v8 = vld [vmem:[%s2164_s10 + $0x70] sm:$0xff] (!%p1248_p5)  ;;  %v890_v9 = vld [vmem:[%s2164_s10 + $0x78] sm:$0xff] (!%p1248_p5)  ;;  %v891_v20 = vld [vmem:[%s2164_s10 + $0x80] sm:$0xff] (!%p1248_p5) }
 0x272   : > { %vm985_vm4 = vcmp.ge.f32.partialorder %v953_v24, 0.0  ;;  %v1017_v40 = vmul.f32 0.01, %v953_v24  ;;  %vm986_vm5 = vcmp.ge.f32.partialorder %v954_v29, 0.0  ;;  %v1018_v58 = vmul.f32 0.01, %v954_v29 }
 0x273   : > { %vm987_vm6 = vcmp.ge.f32.partialorder %v955_v33, 0.0  ;;  %v1019_v60 = vmul.f32 0.01, %v955_v33  ;;  %vm988_vm7 = vcmp.ge.f32.partialorder %v956_v52, 0.0  ;;  %v1020_v61 = vmul.f32 0.01, %v956_v52 }
 0x274   : > { %v1049_v42 = vsel %vm985_vm4, %v953_v24, %v1017_v40  ;;  %v1050_v44 = vsel %vm986_vm5, %v954_v29, %v1018_v58  ;;  %vm989_vm8 = vcmp.ge.f32.partialorder %v957_v54, 0.0  ;;  %v1021_v26 = vmul.f32 0.01, %v957_v54  ;;  %v892_v21 = vld [vmem:[%s2164_s10 + $0x88] sm:$0xff]  ;;  %v893_v30 = vld [vmem:[%s2164_s10 + $0x90] sm:$0xff]  ;;  %v894_v31 = vld [vmem:[%s2164_s10 + $0x98] sm:$0xff] }
 0x275   : > { %1081 = vst [vmem:[%s1786_s27] sm:$0xff] %v1049_v42  ;;  %1082 = vst [vmem:[%s1786_s27 + $0x8] sm:$0xff] %v1050_v44  ;;  %v1051_v3 = vsel %vm987_vm6, %v955_v33, %v1019_v60  ;;  %v1052_v46 = vsel %vm988_vm7, %v956_v52, %v1020_v61  ;;  %vm990_vm9 = vcmp.ge.f32.partialorder %v958_v55, 0.0  ;;  %v1022_v48 = vmul.f32 0.01, %v958_v55  ;;  %v895_v38 = vld [vmem:[%s2164_s10 + $0xa0] sm:$0xff]  ;;  %v896_v40 = vld [vmem:[%s2164_s10 + $0xa8] sm:$0xff] }
 0x276   : > { %1083 = vst [vmem:[%s1786_s27 + $0x10] sm:$0xff] %v1051_v3  ;;  %1084 = vst [vmem:[%s1786_s27 + $0x18] sm:$0xff] %v1052_v46  ;;  %v1053_v49 = vsel %vm989_vm8, %v957_v54, %v1021_v26  ;;  %v923_v47 = vmul.f32 %v2160_v14, %v884_v28  ;;  %v924_v50 = vmul.f32 %v2160_v14, %v885_v0  ;;  %vm991_vm10 = vcmp.ge.f32.partialorder %v959_v32, 0.0  ;;  %v897_v46 = vld [vmem:[%s2164_s10 + $0xb0] sm:$0xff] }
 0x277   : > { %1085 = vst [vmem:[%s1786_s27 + $0x20] sm:$0xff] %v1053_v49  ;;  %v1054_v45 = vsel %vm990_vm9, %v958_v55, %v1022_v48  ;;  %v925_v51 = vmul.f32 %v2160_v14, %v886_v2  ;;  %v1023_v57 = vmul.f32 0.01, %v959_v32  ;;  %vm992_vm11 = vcmp.ge.f32.partialorder %v960_v41, 0.0  ;;  %v898_v48 = vld [vmem:[%s2164_s10 + $0xb8] sm:$0xff] }
 0x278   : > { %1086 = vst [vmem:[%s1786_s27 + $0x28] sm:$0xff] %v1054_v45  ;;  %v1024_v59 = vmul.f32 0.01, %v960_v41  ;;  %v961_v39 = vadd.f32 %v2162_v15, %v922_v43  ;;  %v962_v62 = vadd.f32 %v2162_v15, %v923_v47  ;;  %v963_v63 = vadd.f32 %v2162_v15, %v924_v50 }
 0x279   : > { %v964_v1 = vadd.f32 %v2162_v15, %v925_v51  ;;  %v1055_v4 = vsel %vm991_vm10, %v959_v32, %v1023_v57  ;;  %v926_v6 = vmul.f32 %v2160_v14, %v887_v53  ;;  %v927_v7 = vmul.f32 %v2160_v14, %v888_v56  ;;  %v899_v53 = vld [vmem:[%s2164_s10 + $0xc0] sm:$0xff]  ;;  %v900_v56 = vld [vmem:[%s2164_s10 + $0xc8] sm:$0xff] }
 0x27a   : > { %v1056_v5 = vsel %vm992_vm11, %v960_v41, %v1024_v59  ;;  %1087 = vst [vmem:[%s1786_s27 + $0x30] sm:$0xff] %v1055_v4  ;;  %vm993_vm12 = vcmp.ge.f32.partialorder %v961_v39, 0.0  ;;  %v1025_v10 = vmul.f32 0.01, %v961_v39  ;;  %vm994_vm13 = vcmp.ge.f32.partialorder %v962_v62, 0.0 }
 0x27b   : > { %1088 = vst [vmem:[%s1786_s27 + $0x38] sm:$0xff] %v1056_v5  ;;  %v1026_v11 = vmul.f32 0.01, %v962_v62  ;;  %vm995_vm14 = vcmp.ge.f32.partialorder %v963_v63, 0.0  ;;  %v1027_v12 = vmul.f32 0.01, %v963_v63  ;;  %v965_v18 = vadd.f32 %v2162_v15, %v926_v6 }
 0x27c   : > { %vm996_vm15 = vcmp.ge.f32.partialorder %v964_v1, 0.0  ;;  %v1028_v13 = vmul.f32 0.01, %v964_v1  ;;  %v1057_v16 = vsel %vm993_vm12, %v961_v39, %v1025_v10  ;;  %v966_v19 = vadd.f32 %v2162_v15, %v927_v7 }
 0x27d   : > { %v1058_v17 = vsel %vm994_vm13, %v962_v62, %v1026_v11  ;;  %1089 = vst [vmem:[%s1786_s27 + $0x40] sm:$0xff] %v1057_v16  ;;  %v1059_v22 = vsel %vm995_vm14, %v963_v63, %v1027_v12  ;;  %v928_v25 = vmul.f32 %v2160_v14, %v889_v8  ;;  %v929_v27 = vmul.f32 %v2160_v14, %v890_v9  ;;  %v901_v63 = vld [vmem:[%s2164_s10 + $0xd0] sm:$0xff]  ;;  %v903_v16 = vld [vmem:[%s2164_s10 + $0xe0] sm:$0xff] }
 0x27e   : > { %1090 = vst [vmem:[%s1786_s27 + $0x48] sm:$0xff] %v1058_v17  ;;  %v1060_v23 = vsel %vm996_vm15, %v964_v1, %v1028_v13  ;;  %1091 = vst [vmem:[%s1786_s27 + $0x50] sm:$0xff] %v1059_v22  ;;  %vm997_vm0 = vcmp.ge.f32.partialorder %v965_v18, 0.0  ;;  %v1029_v34 = vmul.f32 0.01, %v965_v18  ;;  %vm998_vm1 = vcmp.ge.f32.partialorder %v966_v19, 0.0 }
 0x27f   : > { %1092 = vst [vmem:[%s1786_s27 + $0x58] sm:$0xff] %v1060_v23  ;;  %v1030_v36 = vmul.f32 0.01, %v966_v19  ;;  %v967_v24 = vadd.f32 %v2162_v15, %v928_v25  ;;  %v968_v29 = vadd.f32 %v2162_v15, %v929_v27  ;;  %v930_v33 = vmul.f32 %v2160_v14, %v891_v20  ;;  %v902_v1 = vld [vmem:[%s2164_s10 + $0xd8] sm:$0xff]  ;;  %v904_v17 = vld [vmem:[%s2164_s10 + $0xe8] sm:$0xff] }
 0x280   : > { %v931_v35 = vmul.f32 %v2160_v14, %v892_v21  ;;  %v1061_v52 = vsel %vm997_vm0, %v965_v18, %v1029_v34  ;;  %v932_v55 = vmul.f32 %v2160_v14, %v893_v30  ;;  %v933_v37 = vmul.f32 %v2160_v14, %v894_v31  ;;  %v905_v34 = vld [vmem:[%s2164_s10 + $0xf0] sm:$0xff] }
 0x281   : > { %v1062_v54 = vsel %vm998_vm1, %v966_v19, %v1030_v36  ;;  %1093 = vst [vmem:[%s1786_s27 + $0x60] sm:$0xff] %v1061_v52  ;;  %vm999_vm2 = vcmp.ge.f32.partialorder %v967_v24, 0.0  ;;  %v1031_v58 = vmul.f32 0.01, %v967_v24  ;;  %vm1000_vm3 = vcmp.ge.f32.partialorder %v968_v29, 0.0  ;;  %v906_v36 = vld [vmem:[%s2164_s10 + $0xf8] sm:$0xff] }
 0x282   : > { %1094 = vst [vmem:[%s1786_s27 + $0x68] sm:$0xff] %v1062_v54  ;;  %v1032_v60 = vmul.f32 0.01, %v968_v29  ;;  %v969_v61 = vadd.f32 %v2162_v15, %v930_v33  ;;  %v970_v42 = vadd.f32 %v2162_v15, %v931_v35  ;;  %v971_v44 = vadd.f32 %v2162_v15, %v932_v55 }
 0x283   : > { %v972_v26 = vadd.f32 %v2162_v15, %v933_v37  ;;  %v1063_v28 = vsel %vm999_vm2, %v967_v24, %v1031_v58  ;;  %v934_v2 = vmul.f32 %v2160_v14, %v895_v38  ;;  %v935_v3 = vmul.f32 %v2160_v14, %v896_v40 }
 0x284   : > { %v1064_v0 = vsel %vm1000_vm3, %v968_v29, %v1032_v60  ;;  %1095 = vst [vmem:[%s1786_s27 + $0x70] sm:$0xff] %v1063_v28  ;;  %vm1001_vm4 = vcmp.ge.f32.partialorder %v969_v61, 0.0  ;;  %v1033_v49 = vmul.f32 0.01, %v969_v61  ;;  %vm1002_vm5 = vcmp.ge.f32.partialorder %v970_v42, 0.0 }
 0x285   : > { %1096 = vst [vmem:[%s1786_s27 + $0x78] sm:$0xff] %v1064_v0  ;;  %v1034_v32 = vmul.f32 0.01, %v970_v42  ;;  %vm1003_vm6 = vcmp.ge.f32.partialorder %v971_v44, 0.0  ;;  %v1035_v41 = vmul.f32 0.01, %v971_v44  ;;  %v973_v50 = vadd.f32 %v2162_v15, %v934_v2 }
 0x286   : > { %vm1004_vm7 = vcmp.ge.f32.partialorder %v972_v26, 0.0  ;;  %v1036_v43 = vmul.f32 0.01, %v972_v26  ;;  %v1065_v45 = vsel %vm1001_vm4, %v969_v61, %v1033_v49  ;;  %v974_v51 = vadd.f32 %v2162_v15, %v935_v3 }
 0x287   : > { %v1066_v47 = vsel %vm1002_vm5, %v970_v42, %v1034_v32  ;;  %1097 = vst [vmem:[%s1786_s27 + $0x80] sm:$0xff] %v1065_v45  ;;  %v1067_v57 = vsel %vm1003_vm6, %v971_v44, %v1035_v41  ;;  %v936_v39 = vmul.f32 %v2160_v14, %v897_v46  ;;  %v937_v62 = vmul.f32 %v2160_v14, %v898_v48 }
 0x288   : > { %1098 = vst [vmem:[%s1786_s27 + $0x88] sm:$0xff] %v1066_v47  ;;  %v1068_v59 = vsel %vm1004_vm7, %v972_v26, %v1036_v43  ;;  %1099 = vst [vmem:[%s1786_s27 + $0x90] sm:$0xff] %v1067_v57  ;;  %vm1005_vm8 = vcmp.ge.f32.partialorder %v973_v50, 0.0  ;;  %v1037_v4 = vmul.f32 0.01, %v973_v50  ;;  %vm1006_vm9 = vcmp.ge.f32.partialorder %v974_v51, 0.0 }
 0x289   : > { %1100 = vst [vmem:[%s1786_s27 + $0x98] sm:$0xff] %v1068_v59  ;;  %v1038_v5 = vmul.f32 0.01, %v974_v51  ;;  %v975_v6 = vadd.f32 %v2162_v15, %v936_v39  ;;  %v976_v7 = vadd.f32 %v2162_v15, %v937_v62  ;;  %v938_v8 = vmul.f32 %v2160_v14, %v899_v53 }
 0x28a   : > { %v939_v9 = vmul.f32 %v2160_v14, %v900_v56  ;;  %v1069_v10 = vsel %vm1005_vm8, %v973_v50, %v1037_v4  ;;  %v940_v12 = vmul.f32 %v2160_v14, %v901_v63  ;;  %v941_v13 = vmul.f32 %v2160_v14, %v902_v1 }
 0x28b   : > { %v1070_v11 = vsel %vm1006_vm9, %v974_v51, %v1038_v5  ;;  %1101 = vst [vmem:[%s1786_s27 + $0xa0] sm:$0xff] %v1069_v10  ;;  %vm1007_vm10 = vcmp.ge.f32.partialorder %v975_v6, 0.0  ;;  %v1039_v18 = vmul.f32 0.01, %v975_v6  ;;  %vm1008_vm11 = vcmp.ge.f32.partialorder %v976_v7, 0.0 }
 0x28c   : > { %1102 = vst [vmem:[%s1786_s27 + $0xa8] sm:$0xff] %v1070_v11  ;;  %v1040_v19 = vmul.f32 0.01, %v976_v7  ;;  %v977_v20 = vadd.f32 %v2162_v15, %v938_v8  ;;  %v978_v21 = vadd.f32 %v2162_v15, %v939_v9  ;;  %v979_v22 = vadd.f32 %v2162_v15, %v940_v12 }
 0x28d   : > { %v980_v23 = vadd.f32 %v2162_v15, %v941_v13  ;;  %v1071_v25 = vsel %vm1007_vm10, %v975_v6, %v1039_v18  ;;  %v942_v30 = vmul.f32 %v2160_v14, %v903_v16  ;;  %v943_v31 = vmul.f32 %v2160_v14, %v904_v17 }
 0x28e   : > { %v1072_v27 = vsel %vm1008_vm11, %v976_v7, %v1040_v19  ;;  %1103 = vst [vmem:[%s1786_s27 + $0xb0] sm:$0xff] %v1071_v25  ;;  %vm1009_vm12 = vcmp.ge.f32.partialorder %v977_v20, 0.0  ;;  %v1041_v24 = vmul.f32 0.01, %v977_v20  ;;  %vm1010_vm13 = vcmp.ge.f32.partialorder %v978_v21, 0.0 }
 0x28f   : > { %1104 = vst [vmem:[%s1786_s27 + $0xb8] sm:$0xff] %v1072_v27  ;;  %v1042_v29 = vmul.f32 0.01, %v978_v21  ;;  %vm1011_vm14 = vcmp.ge.f32.partialorder %v979_v22, 0.0  ;;  %v1043_v33 = vmul.f32 0.01, %v979_v22  ;;  %v981_v55 = vadd.f32 %v2162_v15, %v942_v30 }
 0x290   : > { %vm1012_vm15 = vcmp.ge.f32.partialorder %v980_v23, 0.0  ;;  %v1044_v35 = vmul.f32 0.01, %v980_v23  ;;  %v1073_v52 = vsel %vm1009_vm12, %v977_v20, %v1041_v24  ;;  %v982_v37 = vadd.f32 %v2162_v15, %v943_v31 }
 0x291   : > { %v1074_v54 = vsel %vm1010_vm13, %v978_v21, %v1042_v29  ;;  %1105 = vst [vmem:[%s1786_s27 + $0xc0] sm:$0xff] %v1073_v52  ;;  %v1075_v38 = vsel %vm1011_vm14, %v979_v22, %v1043_v33  ;;  %v944_v58 = vmul.f32 %v2160_v14, %v905_v34  ;;  %v945_v60 = vmul.f32 %v2160_v14, %v906_v36 }
 0x292   : > { %1106 = vst [vmem:[%s1786_s27 + $0xc8] sm:$0xff] %v1074_v54  ;;  %v1076_v40 = vsel %vm1012_vm15, %v980_v23, %v1044_v35  ;;  %1107 = vst [vmem:[%s1786_s27 + $0xd0] sm:$0xff] %v1075_v38  ;;  %vm1013_vm0 = vcmp.ge.f32.partialorder %v981_v55, 0.0  ;;  %v1045_v61 = vmul.f32 0.01, %v981_v55  ;;  %vm1014_vm1 = vcmp.ge.f32.partialorder %v982_v37, 0.0 }
 0x293   : > { %1108 = vst [vmem:[%s1786_s27 + $0xd8] sm:$0xff] %v1076_v40  ;;  %v1046_v42 = vmul.f32 0.01, %v982_v37  ;;  %v983_v44 = vadd.f32 %v2162_v15, %v944_v58  ;;  %v984_v26 = vadd.f32 %v2162_v15, %v945_v60 }
 0x294   : > { %v1077_v28 = vsel %vm1013_vm0, %v981_v55, %v1045_v61 }
 0x295   : > { %v1078_v0 = vsel %vm1014_vm1, %v982_v37, %v1046_v42  ;;  %1109 = vst [vmem:[%s1786_s27 + $0xe0] sm:$0xff] %v1077_v28  ;;  %vm1015_vm2 = vcmp.ge.f32.partialorder %v983_v44, 0.0  ;;  %v1047_v2 = vmul.f32 0.01, %v983_v44  ;;  %vm1016_vm3 = vcmp.ge.f32.partialorder %v984_v26, 0.0 }
 0x296   : > { %1110 = vst [vmem:[%s1786_s27 + $0xe8] sm:$0xff] %v1078_v0  ;;  %v1048_v14 = vmul.f32 0.01, %v984_v26 }
 0x297   : > { %v1079_v3 = vsel %vm1015_vm2, %v983_v44, %v1047_v2 }
 0x298   : > { %v1080_v46 = vsel %vm1016_vm3, %v984_v26, %v1048_v14  ;;  %1111 = vst [vmem:[%s1786_s27 + $0xf0] sm:$0xff] %v1079_v3 }
 0x299   : > { %1112 = vst [vmem:[%s1786_s27 + $0xf8] sm:$0xff] %v1080_v46 }
 0x29a PF: > { %s1121_s11 = smul.u32 %s1651_s18, %s1655_s19  ;;  %s1128_s12 = sshll.u32 %s1786_s27, 4  ;;  %s2297_s12 = int_to_ptr.vmem [resolvable:$true] %s1128_s12 }
 0x29b   : > { %s2306_s30 = scalar_lea.sflag [#allocation6], %s217_s8  ;;  %s1573_s5 = scalar_lea.vmem %s2297_s12, 4096 }
 0x29c   : > { %s1258_s13 = sshll.u32 %s1121_s11, 12  ;;  %p1574_p7 = scmp.ne.s32.totalorder %s2297_s12, %s1573_s5 }
 0x29d   : > { %s2302_s24 = scalar_lea.hbm %s2362_s4, %s1258_s13  ;;  %s1672_s18 = smov [#allocation5]  }
 0x29e   : > { %p1575_p9 = pnand %p1574_p7, %p1753_p6  ;;  %s1577_s19 = sshll.u32 %s1672_s18, 4  ;;  %s1578_s19 = int_to_ptr.vmem [resolvable:$false] %s1577_s19 }
 0x29f   : > { %s1579_s27 = scalar_lea.vmem %s1578_s19, 8192  ;;  %p1580_p11 = scmp.lt.s32.totalorder %s2297_s12, %s1578_s19 }
 0x2a0   : > { %p1576_p10 = pneg %p1575_p9  ;;  %p1581_p12 = scmp.lt.s32.totalorder %s1579_s27, %s1573_s5 }
 0x2a2   : > { %p1582_p13 = por %p1581_p12, %p1580_p11 }
 0x2a4   : > { %p1583_p0 = pnand %p1582_p13, %p1576_p10 }
 0x2a6   : > { %1586 = shalt.err (!%p1583_p0)
}
 0x2a7   : > { %s1587_s8 = scalar_lea.hbm %s2302_s24, 4096  ;;  %s1591_s10 = scalar_lea.hbm %s2362_s4, 8192 }
 0x2a8   : > { %p1588_p1 = scmp.ne.s32.totalorder %s2302_s24, %s1587_s8  ;;  %p1592_p4 = scmp.lt.u32.totalorder %s2302_s24, %s2362_s4 }
 0x2a9   : > { %p1593_p5 = scmp.lt.u32.totalorder %s1591_s10, %s1587_s8  ;;  %p1595_p9 = scmp.lt.u32.totalorder %s1587_s8, %s2302_s24 }
 0x2aa   : > { %p1589_p2 = pnand %p1588_p1, %p1753_p6 }
 0x2ab   : > { %p1594_p7 = por %p1593_p5, %p1592_p4 }
 0x2ac   : > { %p1590_p3 = pneg %p1589_p2 }
 0x2ad   : > { %p1596_p10 = por %p1595_p9, %p1594_p7 }
 0x2af   : > { %p1597_p11 = pnand %p1596_p10, %p1590_p3 }
 0x2b1   : > { %1600 = shalt.err (!%p1597_p11)
}
 0x2b2   : > { %s1673_s14 = smov 128   ;;  %s1674_s23 = smov 8  }
 0x2b3   : > { %1495 = dma.vmem_to_hbm [thread:$0]  (%p1753_p6), %s2297_s12, 4096, %s2302_s24, %s2306_s30, %s1673_s14, %s1673_s14, %s1674_s23  }
 0x2b4 PF: > { %p1501_p12 = scmp.ge.s32.totalorder %s1667_s22, 2  ;;  %s1143_s5 = sand.u32 1, %s1639_s15  }
 0x2b5   : > { %s1144_s18 = scalar_lea.sflag [#allocation6], %s1143_s5 }
 0x2b6   : > { %p1498_p13 = pnand %p1501_p12, %p1760_p8 }
 0x2b8   : > { %1634 = dma.done.wait (!%p1498_p13), %s1144_s18, 4096  }
 0x2b9   : > { %1636 = vsyncadd (!%p1498_p13), %s1144_s18, 4294963200  ;;  %s17_s22 = sadd.s32 1, %s1667_s22   ;;  %s2365_s15 = smov %s1643_s16 }
 0x2ba   : > { %p14_p0 = scmp.ge.s32.totalorder %s17_s22, 6   ;;  %s2366_s16 = smov %s1647_s17 }
 0x2bb   : > { %s2367_s17 = smov %s1769_s7  ;;  %s2368_s18 = smov %s1659_s20 }
 0x2bc   : > { %s2369_s19 = smov %s1663_s21  ;;  %s2370_s20 = smov %s2373_s25 }
 0x2bd   : > { %s2371_s21 = smov %s2377_s26  ;;  %16 = sbr.rel (!%p14_p0) target bundleno = 5 (0x5), region = 89 }
 0x2c4   :  { %1149 = vsyncpa [#allocation6], 1 }
 0x2c5   :  { %1151 = vsyncpa [#allocation6 + $0x1], 1 }

</bundles_post_ra>
